<compile_context>
chip_gen: v6e
topology: v6e:2x2x1
jax: 0.10.0
libtpu: 0.0.40
codegen_flags: <defaults>
</compile_context>

<pallas_src>
import functools

import numpy as np
import jax
import jax.numpy as jnp
from jax import lax
from jax.experimental import pallas as pl
from jax.experimental.pallas import tpu as pltpu

_LANE = 128
_SUBLANE = 8
_MIB = 1024 * 1024


def _round_up(x, m):
    return ((x + m - 1) // m) * m


def _vmem_limit_bytes():
    """Generation-aware explicit scoped-VMEM limit (~half of physical VMEM)."""
    try:
        phys = int(pltpu.get_tpu_info().vmem_capacity_bytes)
    except Exception:
        phys = 64 * _MIB                      # conservative default (v7x-sized)
    return int(min(max(phys // 2, 16 * _MIB), 64 * _MIB))


# ---------------------------------------------------------------------------
# Shared 10-iteration update (rows independent).
#   reference per row:  p = ele - mean(ele)
#                       ele = ele * (1 - abs(p)*sign(p)) + 0.001*(i == 0)
#   abs(p)*sign(p) == p, so ele*(1-p) == a*((1 + mean) - a)  -> strength
#   reduced: the "+1" lives on the (rows, 1) reduced tensor.
# ---------------------------------------------------------------------------
def _iterate(a, n_cols):
    inv_n = jnp.float32(1.0 / n_cols)
    # iteration 0, peeled: the only iteration with the +0.001 bias.
    m1 = jnp.sum(a, axis=1, keepdims=True) * inv_n + 1.0
    a = a * (m1 - a) + jnp.float32(0.001)
    # remaining 9 iterations, fully unrolled (fixed trip count).
    for _ in range(9):
        m1 = jnp.sum(a, axis=1, keepdims=True) * inv_n + 1.0
        a = a * (m1 - a)
    return a


# ---------------------------------------------------------------------------
# Fused path: whole (d, n) array resident in VMEM, single pallas_call.
# ---------------------------------------------------------------------------
def _fused_kernel(x_ref, o_ref, *, n_cols):
    x = x_ref[...]
    cmin = jnp.min(x, axis=0, keepdims=True)               # per-column min
    rng = jnp.max(x, axis=0, keepdims=True) - cmin         # per-column range
    rng = jnp.where(rng == 0.0, jnp.ones_like(rng), rng)   # sklearn zero-range
    a = (x - cmin) * (1.0 / rng)                            # fit_transform
    a = _iterate(a, n_cols)
    o_ref[...] = a * rng + cmin                             # inverse_transform


# ---------------------------------------------------------------------------
# Tiled path, pass 1: global per-column min / range / 1/range.
# The (1, n) outputs keep block index (0, 0) for every step, so they stay
# resident in VMEM as accumulators across the "arbitrary" row-tile reduction.
# A ragged last tile is masked with +/-FLT_MAX using a narrow (tile_d, 1) iota
# so only the two full-width selects touch the whole tile.
# ---------------------------------------------------------------------------
def _stats_kernel(x_ref, cmin_ref, rng_ref, inv_rng_ref, cmax_scr, *,
                  d_valid, tile_d, ragged):
    i = pl.program_id(0)
    x = x_ref[...]
    if ragged:
        row = lax.broadcasted_iota(jnp.int32, (x.shape[0], 1), 0)
        valid = row < (d_valid - i * tile_d)
        big = jnp.float32(np.finfo(np.float32).max)
        tile_min = jnp.min(jnp.where(valid, x, big), axis=0, keepdims=True)
        tile_max = jnp.max(jnp.where(valid, x, -big), axis=0, keepdims=True)
    else:
        tile_min = jnp.min(x, axis=0, keepdims=True)
        tile_max = jnp.max(x, axis=0, keepdims=True)

    @pl.when(i == 0)
    def _():
        cmin_ref[...] = tile_min
        cmax_scr[...] = tile_max

    @pl.when(i > 0)
    def _():
        cmin_ref[...] = jnp.minimum(cmin_ref[...], tile_min)
        cmax_scr[...] = jnp.maximum(cmax_scr[...], tile_max)

    @pl.when(i == pl.num_programs(0) - 1)
    def _():
        r = cmax_scr[...] - cmin_ref[...]
        r = jnp.where(r == 0.0, jnp.ones_like(r), r)  # sklearn zero-range -> 1
        rng_ref[...] = r
        # divide only the (1, n) stats row; the (d, n) data then uses a mul
        inv_rng_ref[...] = 1.0 / r


# ---------------------------------------------------------------------------
# Tiled path, pass 2: per-row-tile scale + 10 iterations + inverse transform.
# Rows are fully independent -> single "parallel" grid axis (megacore on v7x).
# Out-of-bounds rows of a ragged last tile compute garbage whose writes the
# pipeline drops.
# ---------------------------------------------------------------------------
def _update_kernel(cmin_ref, rng_ref, inv_rng_ref, x_ref, o_ref, *, n_cols):
    cmin = cmin_ref[...]
    a = (x_ref[...] - cmin) * inv_rng_ref[...]   # fit_transform (mul by 1/rng)
    a = _iterate(a, n_cols)
    o_ref[...] = a * rng_ref[...] + cmin          # inverse_transform


def mchm_forward(x):
    """x: (1, d, n) -> (1, d, n) float32 (PyTorch reference returns float64)."""
    assert x.ndim == 3 and x.shape[0] == 1
    d, n = int(x.shape[1]), int(x.shape[2])
    x2d = x[0].astype(jnp.float32)                # free squeeze of dim 0

    vmem_limit = _vmem_limit_bytes()

    def cparams(sem):
        return pltpu.CompilerParams(dimension_semantics=sem,
                                    vmem_limit_bytes=vmem_limit)

    row_bytes = _round_up(max(n, _LANE), _LANE) * 4       # VMEM bytes per row
    array_bytes = _round_up(max(d, _SUBLANE), _SUBLANE) * row_bytes

    # ---------------- fused path: everything in one pallas_call -------------
    if array_bytes <= min(8 * _MIB, vmem_limit // 4):
        out2d = pl.pallas_call(
            functools.partial(_fused_kernel, n_cols=n),
            out_shape=jax.ShapeDtypeStruct((d, n), jnp.float32),
            grid_spec=pltpu.PrefetchScalarGridSpec(
                num_scalar_prefetch=0,
                grid=(1,),
                in_specs=[pl.BlockSpec((d, n), lambda i: (0, 0))],
                out_specs=pl.BlockSpec((d, n), lambda i: (0, 0)),
            ),
            compiler_params=cparams(("arbitrary",)),
        )(x2d)
        return out2d.reshape(1, d, n)

    # ---------------- tiled two-pass path ------------------------------------
    def rows_for(budget_bytes, at_most):
        r = max(_SUBLANE, (budget_bytes // row_bytes) // _SUBLANE * _SUBLANE)
        return int(min(r, at_most))

    d8 = _round_up(d, _SUBLANE)
    # pass 1 double-buffers a single input tile (plus masking temps when
    # ragged); pass 2 double-buffers input and output tiles plus loop temps.
    tile1_d = rows_for(vmem_limit // 6, d8)
    tile2_d = rows_for(vmem_limit // 10,
                       max(_SUBLANE, _round_up(pl.cdiv(d, 2), _SUBLANE)))
    grid1 = pl.cdiv(d, tile1_d)
    grid2 = pl.cdiv(d, tile2_d)

    stats_shape = jax.ShapeDtypeStruct((1, n), jnp.float32)
    stats_spec = pl.BlockSpec((1, n), lambda i: (0, 0))

    stats_kernel = functools.partial(
        _stats_kernel, d_valid=d, tile_d=tile1_d, ragged=bool(d % tile1_d))
    cmin, rng, inv_rng = pl.pallas_call(
        stats_kernel,
        out_shape=(stats_shape, stats_shape, stats_shape),
        grid_spec=pltpu.PrefetchScalarGridSpec(
            num_scalar_prefetch=0,
            grid=(grid1,),
            in_specs=[pl.BlockSpec((tile1_d, n), lambda i: (i, 0))],
            out_specs=[stats_spec, stats_spec, stats_spec],
            scratch_shapes=[pltpu.VMEM((1, n), jnp.float32)],
        ),
        compiler_params=cparams(("arbitrary",)),
    )(x2d)

    update_kernel = functools.partial(_update_kernel, n_cols=n)
    out2d = pl.pallas_call(
        update_kernel,
        out_shape=jax.ShapeDtypeStruct((d, n), jnp.float32),
        grid_spec=pltpu.PrefetchScalarGridSpec(
            num_scalar_prefetch=0,
            grid=(grid2,),
            in_specs=[
                stats_spec,                                     # cmin
                stats_spec,                                     # rng
                stats_spec,                                     # 1 / rng
                pl.BlockSpec((tile2_d, n), lambda i: (i, 0)),   # x row tile
            ],
            out_specs=pl.BlockSpec((tile2_d, n), lambda i: (i, 0)),
        ),
        compiler_params=cparams(("parallel",)),
    )(cmin, rng, inv_rng, x2d)

    # torch: .view(1, -1, len(ele)) -> (1, d, n)
    return out2d.reshape(1, d, n)


def _reference_numpy(x):
    """Float64, vectorized mirror of the PyTorch `fun` (MinMaxScaler by hand)."""
    arr = np.asarray(x[0], dtype=np.float64)
    cmin = arr.min(axis=0)
    cmax = arr.max(axis=0)
    rng = np.where(cmax - cmin == 0.0, 1.0, cmax - cmin)
    a = (arr - cmin) / rng
    for i in range(10):
        p = a - a.mean(axis=1, keepdims=True)
        a = a * (1.0 - np.abs(p) * np.sign(p)) + 0.001 * float(i == 0)
    out = a * rng + cmin
    return out.reshape(1, arr.shape[0], arr.shape[1])


if __name__ == "__main__":
    key = jax.random.PRNGKey(0)
    k_small, k_large = jax.random.split(key)

    # small shape matching the module's (1, d, n) contract -> fused path
    d, n = 8, 16
    x = jax.random.normal(k_small, (1, d, n), dtype=jnp.float32) * 3.0 + 1.0
    out = mchm_forward(x)
    jax.block_until_ready(out)
    assert out.shape == (1, d, n), out.shape
    assert out.dtype == jnp.float32
    ref = _reference_numpy(np.asarray(x))
    assert np.allclose(np.asarray(out), ref, rtol=1e-2, atol=1e-2), (
        float(np.max(np.abs(np.asarray(out) - ref))))

    # deliberately ragged larger shape -> exercises the tiled two-pass path
    d2, n2 = 4100, 516
    x2 = jax.random.normal(k_large, (1, d2, n2), dtype=jnp.float32) * 2.0 - 0.5
    out2 = mchm_forward(x2)
    jax.block_until_ready(out2)
    assert out2.shape == (1, d2, n2), out2.shape
    ref2 = _reference_numpy(np.asarray(x2))
    assert np.allclose(np.asarray(out2), ref2, rtol=1e-2, atol=1e-2), (
        float(np.max(np.abs(np.asarray(out2) - ref2))))

    print("KERNEL_OK")
</pallas_src>

<mosaic_0001>
module attributes {stable_mosaic.version = 11 : i64} {
  func.func @_fused_kernel(%arg0: i32, %arg1: memref<8x16xf32, #tpu.memory_space<vmem>>, %arg2: memref<8x16xf32, #tpu.memory_space<vmem>>) attributes {dimension_semantics = [#tpu.dimension_semantics<arbitrary>], iteration_bounds = array<i64: 1>, scalar_prefetch = 0 : i64, scratch_operands = 0 : i64, tpu.core_type = #tpu.core_type<tc>, window_params = [{pipeline_mode = #tpu.pipeline_mode<synchronous>, transform_indices = @transform_0, window_bounds = array<i64: 8, 16>}, {pipeline_mode = #tpu.pipeline_mode<synchronous>, transform_indices = @transform_1, window_bounds = array<i64: 8, 16>}]} {
    %c0 = arith.constant 0 : index
    %c0_0 = arith.constant 0 : index
    %0 = vector.load %arg1[%c0, %c0_0] : memref<8x16xf32, #tpu.memory_space<vmem>>, vector<8x16xf32>
    %cst = arith.constant dense<0x7F800000> : vector<16xf32>
    %1 = vector.multi_reduction <minimumf>, %0, %cst [0] : vector<8x16xf32> to vector<16xf32>
    %2 = vector.shape_cast %1 : vector<16xf32> to vector<1x16xf32>
    %cst_1 = arith.constant dense<0xFF800000> : vector<16xf32>
    %3 = vector.multi_reduction <maximumf>, %0, %cst_1 [0] : vector<8x16xf32> to vector<16xf32>
    %4 = vector.shape_cast %3 : vector<16xf32> to vector<1x16xf32>
    %5 = arith.subf %4, %2 : vector<1x16xf32>
    %cst_2 = arith.constant 0.000000e+00 : f32
    %6 = vector.broadcast %cst_2 : f32 to vector<1x16xf32>
    %7 = arith.cmpf oeq, %5, %6 : vector<1x16xf32>
    %cst_3 = arith.constant 1.000000e+00 : f32
    %8 = vector.broadcast %cst_3 : f32 to vector<1x16xf32>
    %9 = arith.select %7, %8, %5 : vector<1x16xi1>, vector<1x16xf32>
    %10 = vector.broadcast %2 : vector<1x16xf32> to vector<8x16xf32>
    %11 = arith.subf %0, %10 : vector<8x16xf32>
    %cst_4 = arith.constant 1.000000e+00 : f32
    %12 = vector.broadcast %cst_4 : f32 to vector<1x16xf32>
    %13 = arith.divf %12, %9 : vector<1x16xf32>
    %14 = vector.broadcast %13 : vector<1x16xf32> to vector<8x16xf32>
    %15 = arith.mulf %11, %14 : vector<8x16xf32>
    %cst_5 = arith.constant dense<0.000000e+00> : vector<8xf32>
    %16 = vector.multi_reduction <add>, %15, %cst_5 [1] : vector<8x16xf32> to vector<8xf32>
    %17 = vector.shape_cast %16 : vector<8xf32> to vector<8x1xf32>
    %cst_6 = arith.constant 6.250000e-02 : f32
    %18 = vector.broadcast %cst_6 : f32 to vector<8x1xf32>
    %19 = arith.mulf %17, %18 : vector<8x1xf32>
    %cst_7 = arith.constant 1.000000e+00 : f32
    %20 = vector.broadcast %cst_7 : f32 to vector<8x1xf32>
    %21 = arith.addf %19, %20 : vector<8x1xf32>
    %22 = vector.broadcast %21 : vector<8x1xf32> to vector<8x16xf32>
    %23 = arith.subf %22, %15 : vector<8x16xf32>
    %24 = arith.mulf %15, %23 : vector<8x16xf32>
    %cst_8 = arith.constant 1.000000e-03 : f32
    %25 = vector.broadcast %cst_8 : f32 to vector<8x16xf32>
    %26 = arith.addf %24, %25 : vector<8x16xf32>
    %cst_9 = arith.constant dense<0.000000e+00> : vector<8xf32>
    %27 = vector.multi_reduction <add>, %26, %cst_9 [1] : vector<8x16xf32> to vector<8xf32>
    %28 = vector.shape_cast %27 : vector<8xf32> to vector<8x1xf32>
    %cst_10 = arith.constant 6.250000e-02 : f32
    %29 = vector.broadcast %cst_10 : f32 to vector<8x1xf32>
    %30 = arith.mulf %28, %29 : vector<8x1xf32>
    %cst_11 = arith.constant 1.000000e+00 : f32
    %31 = vector.broadcast %cst_11 : f32 to vector<8x1xf32>
    %32 = arith.addf %30, %31 : vector<8x1xf32>
    %33 = vector.broadcast %32 : vector<8x1xf32> to vector<8x16xf32>
    %34 = arith.subf %33, %26 : vector<8x16xf32>
    %35 = arith.mulf %26, %34 : vector<8x16xf32>
    %cst_12 = arith.constant dense<0.000000e+00> : vector<8xf32>
    %36 = vector.multi_reduction <add>, %35, %cst_12 [1] : vector<8x16xf32> to vector<8xf32>
    %37 = vector.shape_cast %36 : vector<8xf32> to vector<8x1xf32>
    %cst_13 = arith.constant 6.250000e-02 : f32
    %38 = vector.broadcast %cst_13 : f32 to vector<8x1xf32>
    %39 = arith.mulf %37, %38 : vector<8x1xf32>
    %cst_14 = arith.constant 1.000000e+00 : f32
    %40 = vector.broadcast %cst_14 : f32 to vector<8x1xf32>
    %41 = arith.addf %39, %40 : vector<8x1xf32>
    %42 = vector.broadcast %41 : vector<8x1xf32> to vector<8x16xf32>
    %43 = arith.subf %42, %35 : vector<8x16xf32>
    %44 = arith.mulf %35, %43 : vector<8x16xf32>
    %cst_15 = arith.constant dense<0.000000e+00> : vector<8xf32>
    %45 = vector.multi_reduction <add>, %44, %cst_15 [1] : vector<8x16xf32> to vector<8xf32>
    %46 = vector.shape_cast %45 : vector<8xf32> to vector<8x1xf32>
    %cst_16 = arith.constant 6.250000e-02 : f32
    %47 = vector.broadcast %cst_16 : f32 to vector<8x1xf32>
    %48 = arith.mulf %46, %47 : vector<8x1xf32>
    %cst_17 = arith.constant 1.000000e+00 : f32
    %49 = vector.broadcast %cst_17 : f32 to vector<8x1xf32>
    %50 = arith.addf %48, %49 : vector<8x1xf32>
    %51 = vector.broadcast %50 : vector<8x1xf32> to vector<8x16xf32>
    %52 = arith.subf %51, %44 : vector<8x16xf32>
    %53 = arith.mulf %44, %52 : vector<8x16xf32>
    %cst_18 = arith.constant dense<0.000000e+00> : vector<8xf32>
    %54 = vector.multi_reduction <add>, %53, %cst_18 [1] : vector<8x16xf32> to vector<8xf32>
    %55 = vector.shape_cast %54 : vector<8xf32> to vector<8x1xf32>
    %cst_19 = arith.constant 6.250000e-02 : f32
    %56 = vector.broadcast %cst_19 : f32 to vector<8x1xf32>
    %57 = arith.mulf %55, %56 : vector<8x1xf32>
    %cst_20 = arith.constant 1.000000e+00 : f32
    %58 = vector.broadcast %cst_20 : f32 to vector<8x1xf32>
    %59 = arith.addf %57, %58 : vector<8x1xf32>
    %60 = vector.broadcast %59 : vector<8x1xf32> to vector<8x16xf32>
    %61 = arith.subf %60, %53 : vector<8x16xf32>
    %62 = arith.mulf %53, %61 : vector<8x16xf32>
    %cst_21 = arith.constant dense<0.000000e+00> : vector<8xf32>
    %63 = vector.multi_reduction <add>, %62, %cst_21 [1] : vector<8x16xf32> to vector<8xf32>
    %64 = vector.shape_cast %63 : vector<8xf32> to vector<8x1xf32>
    %cst_22 = arith.constant 6.250000e-02 : f32
    %65 = vector.broadcast %cst_22 : f32 to vector<8x1xf32>
    %66 = arith.mulf %64, %65 : vector<8x1xf32>
    %cst_23 = arith.constant 1.000000e+00 : f32
    %67 = vector.broadcast %cst_23 : f32 to vector<8x1xf32>
    %68 = arith.addf %66, %67 : vector<8x1xf32>
    %69 = vector.broadcast %68 : vector<8x1xf32> to vector<8x16xf32>
    %70 = arith.subf %69, %62 : vector<8x16xf32>
    %71 = arith.mulf %62, %70 : vector<8x16xf32>
    %cst_24 = arith.constant dense<0.000000e+00> : vector<8xf32>
    %72 = vector.multi_reduction <add>, %71, %cst_24 [1] : vector<8x16xf32> to vector<8xf32>
    %73 = vector.shape_cast %72 : vector<8xf32> to vector<8x1xf32>
    %cst_25 = arith.constant 6.250000e-02 : f32
    %74 = vector.broadcast %cst_25 : f32 to vector<8x1xf32>
    %75 = arith.mulf %73, %74 : vector<8x1xf32>
    %cst_26 = arith.constant 1.000000e+00 : f32
    %76 = vector.broadcast %cst_26 : f32 to vector<8x1xf32>
    %77 = arith.addf %75, %76 : vector<8x1xf32>
    %78 = vector.broadcast %77 : vector<8x1xf32> to vector<8x16xf32>
    %79 = arith.subf %78, %71 : vector<8x16xf32>
    %80 = arith.mulf %71, %79 : vector<8x16xf32>
    %cst_27 = arith.constant dense<0.000000e+00> : vector<8xf32>
    %81 = vector.multi_reduction <add>, %80, %cst_27 [1] : vector<8x16xf32> to vector<8xf32>
    %82 = vector.shape_cast %81 : vector<8xf32> to vector<8x1xf32>
    %cst_28 = arith.constant 6.250000e-02 : f32
    %83 = vector.broadcast %cst_28 : f32 to vector<8x1xf32>
    %84 = arith.mulf %82, %83 : vector<8x1xf32>
    %cst_29 = arith.constant 1.000000e+00 : f32
    %85 = vector.broadcast %cst_29 : f32 to vector<8x1xf32>
    %86 = arith.addf %84, %85 : vector<8x1xf32>
    %87 = vector.broadcast %86 : vector<8x1xf32> to vector<8x16xf32>
    %88 = arith.subf %87, %80 : vector<8x16xf32>
    %89 = arith.mulf %80, %88 : vector<8x16xf32>
    %cst_30 = arith.constant dense<0.000000e+00> : vector<8xf32>
    %90 = vector.multi_reduction <add>, %89, %cst_30 [1] : vector<8x16xf32> to vector<8xf32>
    %91 = vector.shape_cast %90 : vector<8xf32> to vector<8x1xf32>
    %cst_31 = arith.constant 6.250000e-02 : f32
    %92 = vector.broadcast %cst_31 : f32 to vector<8x1xf32>
    %93 = arith.mulf %91, %92 : vector<8x1xf32>
    %cst_32 = arith.constant 1.000000e+00 : f32
    %94 = vector.broadcast %cst_32 : f32 to vector<8x1xf32>
    %95 = arith.addf %93, %94 : vector<8x1xf32>
    %96 = vector.broadcast %95 : vector<8x1xf32> to vector<8x16xf32>
    %97 = arith.subf %96, %89 : vector<8x16xf32>
    %98 = arith.mulf %89, %97 : vector<8x16xf32>
    %cst_33 = arith.constant dense<0.000000e+00> : vector<8xf32>
    %99 = vector.multi_reduction <add>, %98, %cst_33 [1] : vector<8x16xf32> to vector<8xf32>
    %100 = vector.shape_cast %99 : vector<8xf32> to vector<8x1xf32>
    %cst_34 = arith.constant 6.250000e-02 : f32
    %101 = vector.broadcast %cst_34 : f32 to vector<8x1xf32>
    %102 = arith.mulf %100, %101 : vector<8x1xf32>
    %cst_35 = arith.constant 1.000000e+00 : f32
    %103 = vector.broadcast %cst_35 : f32 to vector<8x1xf32>
    %104 = arith.addf %102, %103 : vector<8x1xf32>
    %105 = vector.broadcast %104 : vector<8x1xf32> to vector<8x16xf32>
    %106 = arith.subf %105, %98 : vector<8x16xf32>
    %107 = arith.mulf %98, %106 : vector<8x16xf32>
    %108 = vector.broadcast %9 : vector<1x16xf32> to vector<8x16xf32>
    %109 = arith.mulf %107, %108 : vector<8x16xf32>
    %110 = vector.broadcast %2 : vector<1x16xf32> to vector<8x16xf32>
    %111 = arith.addf %109, %110 : vector<8x16xf32>
    %c0_36 = arith.constant 0 : index
    %c0_37 = arith.constant 0 : index
    %112 = vector.load %arg2[%c0_36, %c0_37] : memref<8x16xf32, #tpu.memory_space<vmem>>, vector<8x16xf32>
    tpu.vector_store %arg2[%c0_36, %c0_37], %111 {strides = array<i32>} : memref<8x16xf32, #tpu.memory_space<vmem>>, vector<8x16xf32>,
    return
  }
  func.func @transform_0(%arg0: i32) -> (i32, i32) {
    %c0_i32 = arith.constant 0 : i32
    %c0_i32_0 = arith.constant 0 : i32
    %c0_i32_1 = arith.constant 0 : i32
    return %c0_i32, %c0_i32_0 : i32, i32
  }
  func.func @transform_1(%arg0: i32) -> (i32, i32) {
    %c0_i32 = arith.constant 0 : i32
    %c0_i32_0 = arith.constant 0 : i32
    %c0_i32_1 = arith.constant 0 : i32
    return %c0_i32, %c0_i32_0 : i32, i32
  }
}

</mosaic_0001>

<bundles_post_ra>
// kernel: tpu_custom_call.1
= control target key start
LH: loop header
LB: loop body
LE: loop exit
PB: predicated region body
PF: predicated region fallthrough
CT: control target
= control target key end

     0   :  { %6 = vsyncpa [#allocation3], 0  ;;  %s221_s0 = inlined_call_operand.hbm [shape: f32[8,16], index: 0, kind: input, shape index: {}]   ;;  %s222_s1 = inlined_call_operand.hbm [shape: f32[8,16], index: 1, kind: output, shape index: {}]  }
   0x1   :  { %7 = vsyncpa [#allocation4], 0  ;;  %s181_s6 = smov [#allocation2]  }
   0x2   :  { %s14_s7 = sshll.u32 %s181_s6, 4  ;;  %s15_s7 = int_to_ptr.vmem [resolvable:$true] %s14_s7 }
   0x3   :  { %s145_s8 = scalar_lea.vmem %s15_s7, 128  ;;  %p150_p1 = scmp.lt.s32.totalorder %s15_s7, %s15_s7 }
   0x4   :  { %p146_p0 = scmp.ne.s32.totalorder %s15_s7, %s145_s8  ;;  %p151_p2 = scmp.lt.s32.totalorder %s145_s8, %s145_s8 }
   0x6   :  { %p152_p3 = por %p151_p2, %p150_p1 }
   0x8   :  { %p153_p4 = pnand %p152_p3, %p146_p0 }
   0xa   :  { %156 = shalt.err (!%p153_p4)
}
   0xb   :  { %17 = dma.hbm_to_vmem [thread:$0]  %s221_s0, 128, %s15_s7, [#allocation3]  }
   0xc   :  { %177 = dma.done.wait [#allocation3], 128  }
   0xd   :  { %178 = vsyncadd [#allocation3], 4294967168  ;;  %vm22_vm0 = vcmask 130048   ;;  %v21_v0 = vld [vmem:[#allocation2] sm:$0xff]  ;;  %s182_s0 = smov [#allocation5]  }
   0xe   :  { %v23_v1 = vsel %vm22_vm0, %v21_v0, inf  ;;  %v30_v2 = vsel %vm22_vm0, %v21_v0, -inf  ;;  %s124_s11 = sshll.u32 %s182_s0, 4  ;;  %s125_s11 = int_to_ptr.vmem [resolvable:$true] %s124_s11 }
   0xf   :  { %v24_v3 = vrot.slane %v23_v1, 4  ;;  %v31_v4 = vrot.slane %v30_v2, 4  ;;  %s157_s12 = scalar_lea.vmem %s125_s11, 128  ;;  %p162_p6 = scmp.lt.s32.totalorder %s125_s11, %s125_s11 }
  0x10   :  { %p158_p5 = scmp.ne.s32.totalorder %s125_s11, %s157_s12  ;;  %p163_p7 = scmp.lt.s32.totalorder %s157_s12, %s157_s12 }
  0x11   :  { %v25_v5 = vmin.f32 %v23_v1, %v24_v3  ;;  %v32_v6 = vmax.f32 %v30_v2, %v31_v4 }
  0x12   :  { %p164_p8 = por %p163_p7, %p162_p6 }
  0x13   :  { %v26_v7 = vrot.slane %v25_v5, 2  ;;  %v33_v8 = vrot.slane %v32_v6, 2 }
  0x14   :  { %p165_p9 = pnand %p164_p8, %p158_p5 }
  0x15   :  { %v27_v9 = vmin.f32 %v25_v5, %v26_v7  ;;  %v34_v10 = vmax.f32 %v32_v6, %v33_v8 }
  0x17   :  { %v28_v11 = vrot.slane %v27_v9, 1  ;;  %v35_v12 = vrot.slane %v34_v10, 1 }
  0x19   :  { %v198_v13 = vmin.f32 %v27_v9, %v28_v11  ;;  %v36_v14 = vmax.f32 %v34_v10, %v35_v12 }
  0x1b   :  { %v37_v15 = vsub.f32 %v36_v14, %v198_v13  ;;  %v40_v17 = vsub.f32 %v21_v0, %v198_v13 }
  0x1d   :  { %vm38_vm1 = vcmp.eq.f32.partialorder %v37_v15, 0.0 }
  0x1e   :  { %v201_v16 = vsel %vm38_vm1, 1.0, %v37_v15 }
  0x1f   :  { %135 = vrcp.f32 %v201_v16 }
  0x2c   :  { %v136_v18 = vpop.eup %135 }
  0x2d   :  { %v43_v19 = vmul.f32 %v136_v18, %v40_v17 }
  0x2f   :  { %v44_v20 = vsel %vm22_vm0, %v43_v19, 0.0 }
  0x30   :  { %45 = vadd.xlane.f32.xlu0 %v44_v20 }
  0xb9   :  { %v46_v21 = vpop.xlane.xlu0 %45 }
  0xba   :  { %v47_v22 = vmul.f32 0.0625, %v46_v21 }
  0xbc   :  { %v48_v23 = vadd.f32 1.0, %v47_v22 }
  0xbe   :  { %v49_v24 = vsub.f32 %v48_v23, %v43_v19 }
  0xc0   :  { %v50_v25 = vmul.f32 %v49_v24, %v43_v19 }
  0xc2   :  { %v51_v26 = vadd.f32 0.001, %v50_v25 }
  0xc4   :  { %v52_v27 = vsel %vm22_vm0, %v51_v26, 0.0 }
  0xc5   :  { %53 = vadd.xlane.f32.xlu0 %v52_v27 }
 0x14e   :  { %v54_v28 = vpop.xlane.xlu0 %53 }
 0x14f   :  { %v55_v29 = vmul.f32 0.0625, %v54_v28 }
 0x151   :  { %v56_v30 = vadd.f32 1.0, %v55_v29 }
 0x153   :  { %v57_v31 = vsub.f32 %v56_v30, %v51_v26 }
 0x155   :  { %v58_v32 = vmul.f32 %v57_v31, %v51_v26 }
 0x157   :  { %v59_v33 = vsel %vm22_vm0, %v58_v32, 0.0 }
 0x158   :  { %60 = vadd.xlane.f32.xlu1 %v59_v33 }
 0x1e1   :  { %v61_v34 = vpop.xlane.xlu1 %60 }
 0x1e2   :  { %v62_v35 = vmul.f32 0.0625, %v61_v34 }
 0x1e4   :  { %v63_v36 = vadd.f32 1.0, %v62_v35 }
 0x1e6   :  { %v64_v37 = vsub.f32 %v63_v36, %v58_v32 }
 0x1e8   :  { %v65_v38 = vmul.f32 %v64_v37, %v58_v32 }
 0x1ea   :  { %v66_v39 = vsel %vm22_vm0, %v65_v38, 0.0 }
 0x1eb   :  { %67 = vadd.xlane.f32.xlu1 %v66_v39 }
 0x274   :  { %v68_v40 = vpop.xlane.xlu1 %67 }
 0x275   :  { %v69_v41 = vmul.f32 0.0625, %v68_v40 }
 0x277   :  { %v70_v42 = vadd.f32 1.0, %v69_v41 }
 0x279   :  { %v71_v43 = vsub.f32 %v70_v42, %v65_v38 }
 0x27b   :  { %v72_v44 = vmul.f32 %v71_v43, %v65_v38 }
 0x27d   :  { %v73_v45 = vsel %vm22_vm0, %v72_v44, 0.0 }
 0x27e   :  { %74 = vadd.xlane.f32.xlu0 %v73_v45 }
 0x307   :  { %v75_v46 = vpop.xlane.xlu0 %74 }
 0x308   :  { %v76_v47 = vmul.f32 0.0625, %v75_v46 }
 0x30a   :  { %v77_v48 = vadd.f32 1.0, %v76_v47 }
 0x30c   :  { %v78_v49 = vsub.f32 %v77_v48, %v72_v44 }
 0x30e   :  { %v79_v50 = vmul.f32 %v78_v49, %v72_v44 }
 0x310   :  { %v80_v51 = vsel %vm22_vm0, %v79_v50, 0.0 }
 0x311   :  { %81 = vadd.xlane.f32.xlu1 %v80_v51 }
 0x39a   :  { %v82_v52 = vpop.xlane.xlu1 %81 }
 0x39b   :  { %v83_v53 = vmul.f32 0.0625, %v82_v52 }
 0x39d   :  { %v84_v54 = vadd.f32 1.0, %v83_v53 }
 0x39f   :  { %v85_v55 = vsub.f32 %v84_v54, %v79_v50 }
 0x3a1   :  { %v86_v56 = vmul.f32 %v85_v55, %v79_v50 }
 0x3a3   :  { %v87_v57 = vsel %vm22_vm0, %v86_v56, 0.0 }
 0x3a4   :  { %88 = vadd.xlane.f32.xlu0 %v87_v57 }
 0x42d   :  { %v89_v58 = vpop.xlane.xlu0 %88 }
 0x42e   :  { %v90_v59 = vmul.f32 0.0625, %v89_v58 }
 0x430   :  { %v91_v60 = vadd.f32 1.0, %v90_v59 }
 0x432   :  { %v92_v61 = vsub.f32 %v91_v60, %v86_v56 }
 0x434   :  { %v93_v62 = vmul.f32 %v92_v61, %v86_v56 }
 0x436   :  { %v94_v63 = vsel %vm22_vm0, %v93_v62, 0.0 }
 0x437   :  { %95 = vadd.xlane.f32.xlu1 %v94_v63 }
 0x4c0   :  { %v96_v0 = vpop.xlane.xlu1 %95 }
 0x4c1   :  { %v97_v1 = vmul.f32 0.0625, %v96_v0 }
 0x4c3   :  { %v98_v2 = vadd.f32 1.0, %v97_v1 }
 0x4c5   :  { %v99_v3 = vsub.f32 %v98_v2, %v93_v62 }
 0x4c7   :  { %v100_v4 = vmul.f32 %v99_v3, %v93_v62 }
 0x4c9   :  { %v101_v5 = vsel %vm22_vm0, %v100_v4, 0.0 }
 0x4ca   :  { %102 = vadd.xlane.f32.xlu0 %v101_v5 }
 0x553   :  { %v103_v6 = vpop.xlane.xlu0 %102 }
 0x554   :  { %v104_v7 = vmul.f32 0.0625, %v103_v6 }
 0x556   :  { %v105_v8 = vadd.f32 1.0, %v104_v7 }
 0x558   :  { %v106_v9 = vsub.f32 %v105_v8, %v100_v4 }
 0x55a   :  { %v107_v10 = vmul.f32 %v106_v9, %v100_v4 }
 0x55c   :  { %v108_v11 = vsel %vm22_vm0, %v107_v10, 0.0 }
 0x55d   :  { %109 = vadd.xlane.f32.xlu1 %v108_v11 }
 0x5e6   :  { %v110_v12 = vpop.xlane.xlu1 %109 }
 0x5e7   :  { %v111_v14 = vmul.f32 0.0625, %v110_v12 }
 0x5e9   :  { %v112_v15 = vadd.f32 1.0, %v111_v14 }
 0x5eb   :  { %v113_v17 = vsub.f32 %v112_v15, %v107_v10 }
 0x5ed   :  { %v114_v18 = vmul.f32 %v113_v17, %v107_v10 }
 0x5ef   :  { %v115_v19 = vmul.f32 %v114_v18, %v201_v16 }
 0x5f1   :  { %v116_v20 = vadd.f32 %v115_v19, %v198_v13 }
 0x5f3   :  { %117 = vst.msk [vmem:[#allocation5] sm:$0xff] %vm22_vm0, %v116_v20 }
 0x5f4   :  { %168 = shalt.err (!%p165_p9)
}
 0x5f5   :  { %127 = dma.vmem_to_hbm [thread:$0]  %s125_s11, 128, %s222_s1, [#allocation4]  }
 0x5f6   :  { %179 = dma.done.wait [#allocation4], 128  }
 0x5f7   :  { %180 = vsyncadd [#allocation4], 4294967168 }
 0x5f8   :  { %131 = vsyncpa [#allocation3], 1 }
 0x5f9   :  { %132 = vsyncpa [#allocation4], 1 }

</bundles_post_ra>
